<compile_context>
chip_gen: v6e
topology: v6e:2x2x1
jax: 0.10.0
libtpu: 0.0.40
codegen_flags: <defaults>
</compile_context>

<pallas_src>
import jax
import jax.numpy as jnp
from jax.experimental import pallas as pl
from jax.experimental.pallas import tpu as pltpu


_IN = 28 * 28      # 784
_HID = 32
_NCLS = 10
_OUT_PAD = 128     # lane-dense padded output width (true logits = first 10 cols)


def _round_up(x, m):
    return ((x + m - 1) // m) * m


def _digits_kernel(x_ref, w1_ref, b1_ref, w2_ref, b2_ref, out_ref):
    # x_ref : (TB, 784)  f32  (cast to bf16 here: free VPU filler, mem-bound kernel)
    # w1_ref: (784, 32)  bf16        b1_ref: (1, 32)   f32
    # w2_ref: (32, 128)  bf16 (cols 10..127 are zero)
    # b2_ref: (1, 128)   f32  (cols 10..127 are zero)
    # out_ref: (TB, 128) out_dtype
    x = x_ref[...].astype(jnp.bfloat16)
    h = jnp.dot(x, w1_ref[...], preferred_element_type=jnp.float32)
    h = jax.nn.sigmoid(h + b1_ref[...])
    o = jnp.dot(h.astype(jnp.bfloat16), w2_ref[...],
                preferred_element_type=jnp.float32)
    out_ref[...] = (o + b2_ref[...]).astype(out_ref.dtype)


def digits_forward(x, w1, b1, w2, b2, *, block_b=2048,
                   out_dtype=jnp.bfloat16, min_kernel_batch=64):
    """Forward pass of the Digits MLP.

    x : (..., 28, 28) or (B, 784)          -- flattened to (B, 784)
    w1: (32, 784)  b1: (32,)               -- PyTorch Linear layout (out, in)
    w2: (10, 32)   b2: (10,)
    returns (B, 10) logits in `out_dtype` (f32 accumulation throughout).

    block_b: upper bound on the batch tile (rounded to a multiple of 16); it
    is further clamped so the grid has >= 2 steps (v7x megacore).
    """
    x2d = x.reshape(-1, _IN).astype(jnp.float32)
    B = x2d.shape[0]

    if B < min_kernel_batch:
        # Tiny-batch fallback: fused XLA matmuls beat the fixed kernel overhead.
        h = jax.nn.sigmoid(x2d @ jnp.transpose(w1).astype(jnp.float32)
                           + b1.astype(jnp.float32))
        o = h @ jnp.transpose(w2).astype(jnp.float32) + b2.astype(jnp.float32)
        return o.astype(jnp.float32)

    # Parameters: transpose to (in, out) for the MXU; bf16 weights, f32 biases.
    # Lane-dense output: zero-pad N from 10 -> 128 (padded logit cols are 0).
    w1_t = jnp.transpose(w1).astype(jnp.bfloat16)                    # (784, 32)
    b1_r = b1.reshape(1, -1).astype(jnp.float32)                     # (1, 32)
    w2_t = jnp.transpose(w2).astype(jnp.bfloat16)                    # (32, 10)
    w2_p = jnp.pad(w2_t, ((0, 0), (0, _OUT_PAD - _NCLS)))            # (32, 128)
    b2_p = jnp.pad(b2.reshape(1, -1).astype(jnp.float32),
                   ((0, 0), (0, _OUT_PAD - _NCLS)))                  # (1, 128)

    # Batch tile: multiple of 16 (bf16 sublane packing of out / f32 of x), and
    # clamped so the grid has at least 2 steps (keeps both v7x TCs busy).
    tb = max(16, _round_up(int(block_b), 16))
    tb = min(tb, _round_up(pl.cdiv(B, 2), 16))
    grid = pl.cdiv(B, tb)   # ragged last block handled by Pallas edge masking

    # Scoped-VMEM budget: double-buffered x + out tiles, plus resident params.
    out_isize = jnp.dtype(out_dtype).itemsize
    vmem_need = (2 * tb * (_IN * 4 + _OUT_PAD * out_isize)
                 + 2 * (_IN * _HID * 2 + _HID * _OUT_PAD * 2
                        + _HID * 4 + _OUT_PAD * 4))
    vmem_limit = int(min(max(vmem_need + (8 << 20), 16 << 20), 48 << 20))

    out = pl.pallas_call(
        _digits_kernel,
        out_shape=jax.ShapeDtypeStruct((B, _OUT_PAD), out_dtype),
        grid_spec=pltpu.PrefetchScalarGridSpec(
            num_scalar_prefetch=0,
            grid=(grid,),
            in_specs=[
                pl.BlockSpec((tb, _IN), lambda i: (i, 0)),        # x  (streamed)
                pl.BlockSpec((_IN, _HID), lambda i: (0, 0)),      # W1 (resident)
                pl.BlockSpec((1, _HID), lambda i: (0, 0)),        # b1 (resident)
                pl.BlockSpec((_HID, _OUT_PAD), lambda i: (0, 0)),  # W2 (resident)
                pl.BlockSpec((1, _OUT_PAD), lambda i: (0, 0)),     # b2 (resident)
            ],
            out_specs=pl.BlockSpec((tb, _OUT_PAD), lambda i: (i, 0)),
        ),
        compiler_params=pltpu.CompilerParams(
            # Rows are independent -> megacore-shard the batch axis on v7x.
            dimension_semantics=("parallel",),
            vmem_limit_bytes=vmem_limit),
    )(x2d, w1_t, b1_r, w2_p, b2_p)

    # Drop the zero-padded logit columns (10..127).  No batch padding to drop.
    return out[:, :_NCLS]


def _init_params(key):
    """Deterministic init mimicking PyTorch nn.Linear defaults (U(+-1/sqrt(fan_in)))."""
    k1, k2, k3, k4 = jax.random.split(key, 4)
    bound1 = 1.0 / jnp.sqrt(784.0)
    bound2 = 1.0 / jnp.sqrt(32.0)
    w1 = jax.random.uniform(k1, (_HID, _IN), jnp.float32, -bound1, bound1)
    b1 = jax.random.uniform(k2, (_HID,), jnp.float32, -bound1, bound1)
    w2 = jax.random.uniform(k3, (_NCLS, _HID), jnp.float32, -bound2, bound2)
    b2 = jax.random.uniform(k4, (_NCLS,), jnp.float32, -bound2, bound2)
    return w1, b1, w2, b2


if __name__ == "__main__":
    key = jax.random.PRNGKey(0)
    kx1, kx2, kx3, kp = jax.random.split(key, 4)
    w1, b1, w2, b2 = _init_params(kp)

    def ref_fp32(xf):
        x2d = xf.reshape(-1, _IN)
        return jax.nn.sigmoid(x2d @ w1.T + b1) @ w2.T + b2

    def ref_mixed(xf):
        # Matches the kernel's mixed precision (bf16 operands, f32 accumulate).
        x2d = xf.reshape(-1, _IN).astype(jnp.bfloat16)
        h = jax.nn.sigmoid(
            jnp.dot(x2d, w1.T.astype(jnp.bfloat16),
                    preferred_element_type=jnp.float32) + b1)
        return jnp.dot(h.astype(jnp.bfloat16), w2.T.astype(jnp.bfloat16),
                       preferred_element_type=jnp.float32) + b2

    # Case 1: ragged batch through the kernel (tb=112, grid=2, masked last block),
    # default bf16 logits.
    B1 = 200
    x1 = jax.random.normal(kx1, (B1, 1, 28, 28), jnp.float32)
    out1 = jax.block_until_ready(digits_forward(x1, w1, b1, w2, b2))
    assert out1.shape == (B1, _NCLS)
    assert out1.dtype == jnp.bfloat16
    o1 = out1.astype(jnp.float32)
    assert jnp.max(jnp.abs(o1 - ref_mixed(x1))) < 1.5e-2
    assert jnp.max(jnp.abs(o1 - ref_fp32(x1))) < 7e-2

    # Case 2: exactly-divisible batch, small tile (grid=4), f32 logits.
    B2 = 256
    x2 = jax.random.normal(kx2, (B2, 1, 28, 28), jnp.float32)
    out2 = jax.block_until_ready(
        digits_forward(x2, w1, b1, w2, b2, block_b=64, out_dtype=jnp.float32))
    assert out2.shape == (B2, _NCLS) and out2.dtype == jnp.float32
    assert jnp.max(jnp.abs(out2 - ref_mixed(x2))) < 5e-3
    assert jnp.max(jnp.abs(out2 - ref_fp32(x2))) < 7e-2

    # Case 3: tiny batch takes the pure-jnp fallback path.
    B3 = 8
    x3 = jax.random.normal(kx3, (B3, 1, 28, 28), jnp.float32)
    out3 = jax.block_until_ready(digits_forward(x3, w1, b1, w2, b2))
    assert out3.shape == (B3, _NCLS)
    assert jnp.max(jnp.abs(out3 - ref_fp32(x3))) < 1e-4

    print("KERNEL_OK")
</pallas_src>

<mosaic_0001>
module attributes {stable_mosaic.version = 11 : i64} {
  func.func @_digits_kernel(%arg0: i32, %arg1: memref<112x784xf32, #tpu.memory_space<vmem>>, %arg2: memref<784x32xbf16, #tpu.memory_space<vmem>>, %arg3: memref<1x32xf32, #tpu.memory_space<vmem>>, %arg4: memref<32x128xbf16, #tpu.memory_space<vmem>>, %arg5: memref<1x128xf32, #tpu.memory_space<vmem>>, %arg6: memref<112x128xbf16, #tpu.memory_space<vmem>>) attributes {dimension_semantics = [#tpu.dimension_semantics<parallel>], iteration_bounds = array<i64: 2>, scalar_prefetch = 0 : i64, scratch_operands = 0 : i64, tpu.core_type = #tpu.core_type<tc>, window_params = [{transform_indices = @transform_0, window_bounds = array<i64: 112, 784>}, {pipeline_mode = #tpu.pipeline_mode<synchronous>, transform_indices = @transform_1, window_bounds = array<i64: 784, 32>}, {pipeline_mode = #tpu.pipeline_mode<synchronous>, transform_indices = @transform_2, window_bounds = array<i64: 1, 32>}, {pipeline_mode = #tpu.pipeline_mode<synchronous>, transform_indices = @transform_3, window_bounds = array<i64: 32, 128>}, {pipeline_mode = #tpu.pipeline_mode<synchronous>, transform_indices = @transform_4, window_bounds = array<i64: 1, 128>}, {transform_indices = @transform_5, window_bounds = array<i64: 112, 128>}]} {
    %c0 = arith.constant 0 : index
    %c0_0 = arith.constant 0 : index
    %0 = vector.load %arg1[%c0, %c0_0] : memref<112x784xf32, #tpu.memory_space<vmem>>, vector<112x784xf32>
    %1 = arith.truncf %0 : vector<112x784xf32> to vector<112x784xbf16>
    %c0_1 = arith.constant 0 : index
    %c0_2 = arith.constant 0 : index
    %2 = vector.load %arg2[%c0_1, %c0_2] : memref<784x32xbf16, #tpu.memory_space<vmem>>, vector<784x32xbf16>
    %cst = arith.constant dense<0.000000e+00> : vector<112x32xf32>
    %3 = tpu.matmul %1, %2, %cst {dimension_numbers = #tpu.dot_dimension_numbers<[1], [0], [0], [1], [0, 0, 1, 1], [], []>} : vector<112x784xbf16>, vector<784x32xbf16>, vector<112x32xf32> -> vector<112x32xf32>
    %c0_3 = arith.constant 0 : index
    %c0_4 = arith.constant 0 : index
    %4 = vector.load %arg3[%c0_3, %c0_4] : memref<1x32xf32, #tpu.memory_space<vmem>>, vector<1x32xf32>
    %5 = vector.broadcast %4 : vector<1x32xf32> to vector<112x32xf32>
    %6 = arith.addf %3, %5 : vector<112x32xf32>
    %7 = arith.negf %6 : vector<112x32xf32>
    %8 = math.exp %7 : vector<112x32xf32>
    %cst_5 = arith.constant 1.000000e+00 : f32
    %9 = vector.broadcast %cst_5 : f32 to vector<112x32xf32>
    %10 = arith.addf %9, %8 : vector<112x32xf32>
    %11 = arith.divf %9, %10 : vector<112x32xf32>
    %12 = arith.truncf %11 : vector<112x32xf32> to vector<112x32xbf16>
    %c0_6 = arith.constant 0 : index
    %c0_7 = arith.constant 0 : index
    %13 = vector.load %arg4[%c0_6, %c0_7] : memref<32x128xbf16, #tpu.memory_space<vmem>>, vector<32x128xbf16>
    %cst_8 = arith.constant dense<0.000000e+00> : vector<112x128xf32>
    %14 = tpu.matmul %12, %13, %cst_8 {dimension_numbers = #tpu.dot_dimension_numbers<[1], [0], [0], [1], [0, 0, 1, 1], [], []>} : vector<112x32xbf16>, vector<32x128xbf16>, vector<112x128xf32> -> vector<112x128xf32>
    %c0_9 = arith.constant 0 : index
    %c0_10 = arith.constant 0 : index
    %15 = vector.load %arg5[%c0_9, %c0_10] : memref<1x128xf32, #tpu.memory_space<vmem>>, vector<1x128xf32>
    %16 = vector.broadcast %15 : vector<1x128xf32> to vector<112x128xf32>
    %17 = arith.addf %14, %16 : vector<112x128xf32>
    %18 = arith.truncf %17 : vector<112x128xf32> to vector<112x128xbf16>
    %c0_11 = arith.constant 0 : index
    %c0_12 = arith.constant 0 : index
    %19 = vector.load %arg6[%c0_11, %c0_12] : memref<112x128xbf16, #tpu.memory_space<vmem>>, vector<112x128xbf16>
    tpu.vector_store %arg6[%c0_11, %c0_12], %18 {strides = array<i32>} : memref<112x128xbf16, #tpu.memory_space<vmem>>, vector<112x128xbf16>,
    return
  }
  func.func @transform_0(%arg0: i32) -> (i32, i32) {
    %c0_i32 = arith.constant 0 : i32
    %c0_i32_0 = arith.constant 0 : i32
    return %arg0, %c0_i32 : i32, i32
  }
  func.func @transform_1(%arg0: i32) -> (i32, i32) {
    %c0_i32 = arith.constant 0 : i32
    %c0_i32_0 = arith.constant 0 : i32
    %c0_i32_1 = arith.constant 0 : i32
    return %c0_i32, %c0_i32_0 : i32, i32
  }
  func.func @transform_2(%arg0: i32) -> (i32, i32) {
    %c0_i32 = arith.constant 0 : i32
    %c0_i32_0 = arith.constant 0 : i32
    %c0_i32_1 = arith.constant 0 : i32
    return %c0_i32, %c0_i32_0 : i32, i32
  }
  func.func @transform_3(%arg0: i32) -> (i32, i32) {
    %c0_i32 = arith.constant 0 : i32
    %c0_i32_0 = arith.constant 0 : i32
    %c0_i32_1 = arith.constant 0 : i32
    return %c0_i32, %c0_i32_0 : i32, i32
  }
  func.func @transform_4(%arg0: i32) -> (i32, i32) {
    %c0_i32 = arith.constant 0 : i32
    %c0_i32_0 = arith.constant 0 : i32
    %c0_i32_1 = arith.constant 0 : i32
    return %c0_i32, %c0_i32_0 : i32, i32
  }
  func.func @transform_5(%arg0: i32) -> (i32, i32) {
    %c0_i32 = arith.constant 0 : i32
    %c0_i32_0 = arith.constant 0 : i32
    return %arg0, %c0_i32 : i32, i32
  }
}

</mosaic_0001>

<bundles_post_ra>
// kernel: tpu_custom_call.1
= control target key start
LH: loop header
LB: loop body
LE: loop exit
PB: predicated region body
PF: predicated region fallthrough
CT: control target
= control target key end

     0   :  { %10 = vsyncpa [#allocation3], 0  ;;  %s2959_s0 = inlined_call_operand.hbm [shape: f32[200,784], index: 0, kind: input, shape index: {}]   ;;  %s2960_s1 = inlined_call_operand.vmem [shape: bf16[784,32], index: 1, kind: input, shape index: {}]   ;;  %s2961_s2 = inlined_call_operand.vmem [shape: f32[1,32], index: 2, kind: input, shape index: {}]   ;;  %s2962_s3 = inlined_call_operand.vmem [shape: bf16[32,128], index: 3, kind: input, shape index: {}]   ;;  %s2963_s4 = inlined_call_operand.vmem [shape: f32[1,128], index: 4, kind: input, shape index: {}]   ;;  %s2964_s5 = inlined_call_operand.hbm [shape: bf16[200,128], index: 5, kind: output, shape index: {}]  }
   0x1   :  { %12 = vsyncpa [#allocation3 + $0x1], 0 }
   0x2   :  { %13 = vsyncpa [#allocation4], 0 }
   0x3   :  { %15 = vsyncpa [#allocation4 + $0x1], 0  ;;  %s2298_s18 = smov 0   ;;  %s2300_s19 = smov 0  }
   0x4   :  { %s2302_s20 = smov 0   ;;  %s2304_s21 = smov 0  }
   0x5 LB: > { %s2319_s22 = sadd.s32 4294967295, %s2258_s21   ;;  %s1575_s23 = sadd.s32 4294967294, %s2258_s21   ;;  %s2258_s21 = sphi %s2304_s21, %s2997_s21   ;;  %s2254_s20 = sphi %s2302_s20, %s2996_s20   ;;  %s2250_s19 = sphi %s2300_s19, %s2995_s19   ;;  %s2246_s18 = sphi %s2298_s18, %s2994_s18  }
   0x6   : > { %s2323_s24 = sadd.s32 1, %s2258_s21   ;;  %s28_s25 = sadd.s32 1, %s2254_s20 }
   0x7   : > { %s25_s26 = ssub.s32 %s2258_s21, %s2323_s24  ;;  %p35_p0 = scmp.ne.s32.totalorder %s2254_s20, %s2250_s19 }
   0x8   : > { %p26_p1 = scmp.eq.s32.totalorder %s25_s26, 0  ;;  %p36_p2 = scmp.eq.s32.totalorder %s2258_s21, 0 }
   0x9   : > { %p41_p3 = scmp.ne.s32.totalorder %s2250_s19, %s2246_s18  ;;  %p42_p4 = scmp.eq.s32.totalorder %s2319_s22, 0 }
   0xa   : > { %s2335_s27 = scalar_select %p26_p1, %s2254_s20, %s28_s25  }
   0xb   : > { %p37_p5 = por %p36_p2, %p35_p0  ;;  %p2337_p6 = por %p42_p4, %p41_p3 }
   0xc   : > { %p149_p7 = scmp.eq.s32.totalorder %s2319_s22, 1  ;;  %p155_p8 = scmp.eq.s32.totalorder %s1575_s23, 1 }
   0xd   : > { %p2965_p11 = scmp.ge.s32.totalorder %s2258_s21, 2 }
   0xe   : > { %p2342_p9 = por %p149_p7, %p35_p0  ;;  %p2346_p10 = por %p155_p8, %p41_p3 }
   0xf   : > { %183 = sbr.rel (%p2965_p11) target bundleno = 55 (0x37), region = 32 }
  0x10   : > { %s2970_s30 = scalar_select %p2346_p10, 1, 0 }
  0x14   : > { %186 = sbr.rel (!%p37_p5) target bundleno = 55 (0x37), region = 36  ;;  %s187_s6 = sand.u32 (%p37_p5), 1, %s2254_s20  }
  0x15   : > { %s192_s7 = smul.u32 (%p37_p5), 14, %s2258_s21  ;;  %s2358_s12 = scalar_lea.sflag (%p37_p5), [#allocation3], %s187_s6 }
  0x16   : > { %s2011_s8 = smul.u32 (%p37_p5), 784, %s187_s6 }
  0x17   : > { %s193_s9 = ssub.s32 (%p37_p5), 25, %s192_s7 }
  0x18   : > { %p194_p12 = scmp.lt.s32.totalorder (%p37_p5), %s193_s9, 14  ;;  %s191_s13 = scalar_lea.vmem (%p37_p5), [#allocation2], %s2011_s8 }
  0x1a   : > { %s2999_s9 = smov (!%p194_p12, %s193_s9), 14 }
  0x1b   : > { %s2355_s10 = smul.u32 896, %s2999_s9 }
  0x1d   : > { %s199_s11 = ssub.s32 12544, %s2355_s10 }
  0x1e   : > { %200 = vsyncadd %s2358_s12, %s199_s11  ;;  %p1580_p13 = scmp.ne.s32.totalorder %s2355_s10, 0  ;;  %s2021_s14 = smul.u32 12544, %s2258_s21 }
  0x1f   : > { %s206_s15 = sshll.u32 %s191_s13, 4  ;;  %s2172_s7 = scalar_lea.hbm %s2959_s0, 22400  ;;  %s2368_s15 = int_to_ptr.vmem [resolvable:$true] %s206_s15 }
  0x20   : > { %s2366_s23 = scalar_lea.hbm %s2959_s0, %s2021_s14 }
  0x21   : > { %s2168_s25 = scalar_lea.hbm %s2366_s23, %s2355_s10  ;;  %p2173_p3 = scmp.lt.s32.totalorder %s2366_s23, %s2959_s0 }
  0x22   : > { %p2169_p0 = scmp.ne.s32.totalorder %s2366_s23, %s2168_s25  ;;  %p2174_p4 = scmp.lt.s32.totalorder %s2172_s7, %s2168_s25 }
  0x24   : > { %p2170_p1 = pnand %p2169_p0, %p1580_p13  ;;  %p2175_p5 = por %p2174_p4, %p2173_p3 }
  0x26   : > { %p2171_p2 = pneg %p2170_p1 }
  0x28   : > { %p2176_p7 = pnand %p2175_p5, %p2171_p2 }
  0x2a   : > { %2179 = shalt.err (!%p2176_p7)
}
  0x2b   : > { %s2180_s11 = scalar_lea.vmem %s2368_s15, %s2355_s10  ;;  %s2260_s13 = smov [#allocation2]  }
  0x2c   : > { %p2181_p8 = scmp.ne.s32.totalorder %s2368_s15, %s2180_s11  ;;  %s2184_s14 = sshll.u32 %s2260_s13, 4  ;;  %s2185_s14 = int_to_ptr.vmem [resolvable:$false] %s2184_s14 }
  0x2d   : > { %s2186_s16 = scalar_lea.vmem %s2185_s14, 25088  ;;  %p2187_p1 = scmp.lt.s32.totalorder %s2368_s15, %s2185_s14 }
  0x2e   : > { %p2182_p12 = pnand %p2181_p8, %p1580_p13  ;;  %p2188_p11 = scmp.lt.s32.totalorder %s2186_s16, %s2180_s11 }
  0x30   : > { %p2183_p0 = pneg %p2182_p12  ;;  %p2189_p10 = por %p2188_p11, %p2187_p1 }
  0x32   : > { %p2190_p3 = pnand %p2189_p10, %p2183_p0 }
  0x34   : > { %2193 = shalt.err (!%p2190_p3)
}
  0x35   : > { %s2261_s17 = smov 896   ;;  %s2262_s25 = smov 56  }
  0x36   : > { %212 = dma.hbm_to_vmem [thread:$0]  (%p1580_p13), %s2366_s23, %s2355_s10, %s2368_s15, %s2358_s12, %s2261_s17, %s2261_s17, %s2262_s25  }
  0x37 PF: > { %p1583_p2 = scmp.ge.s32.totalorder %s2258_s21, 1  ;;  %p214_p4 = scmp.lt.s32.totalorder %s2258_s21, 3 }
  0x39   : > { %p215_p5 = pnand %p1583_p2, %p214_p4 }
  0x3b   : > { %218 = sbr.rel (%p215_p5) target bundleno = 701 (0x2bd), region = 40 }
  0x40   : > { %s2397_s26 = sand.u32 1, %s2250_s19  }
  0x41   : > { %s2013_s6 = smul.u32 784, %s2397_s26  ;;  %s221_s7 = scalar_lea.sflag [#allocation3], %s2397_s26 }
  0x43   : > { %s2401_s8 = scalar_lea.vmem [#allocation2], %s2013_s6 }
  0x44   : > { %2237 = dma.done.wait (%p2337_p6), %s221_s7, 12544  }
  0x45   : > { %2239 = vsyncadd (%p2337_p6), %s221_s7, 4294954752  ;;  %v2061_v0 = vld [vmem:[%s2960_s1 + $0x78] sm:$0xff]   ;;  %v2063_v2 = vld [vmem:[%s2960_s1 + $0x70] sm:$0xff]   ;;  %vm2264_vm0 = vmmov 0   ;;  %vm809_vm1 = vcmask 130048   ;;  %vm1301_vm2 = vcmask 261120  }
  0x46   : > { %v2062_v1 = vld [vmem:[%s2960_s1 + $0x38] sm:$0xff]   ;;  %1995 = vmatprep.subr.bf16.mxu1 %v2061_v0  ;;  %1742 = vmatprep.subr.bf16.mxu0 %v2061_v0  ;;  %v2064_v3 = vld [vmem:[%s2960_s1 + $0x30] sm:$0xff]   ;;  %v2065_v4 = vld [vmem:[%s2960_s1 + $0x68] sm:$0xff]   ;;  %s2014_s14 = smul.u32 56, %s2397_s26  ;;  %s1483_s16 = scalar_lea.sflag [#allocation4], %s2397_s26 }
  0x47   : > { %2003 = vmatpush3.bf16.msra.mxu1 %v2062_v1  ;;  %1743 = vmatpush3.bf16.msra.mxu0 %v2062_v1  ;;  %v2066_v5 = vld [vmem:[%s2960_s1 + $0x28] sm:$0xff]   ;;  %v2067_v6 = vld [vmem:[%s2960_s1 + $0x60] sm:$0xff]   ;;  %v2069_v8 = vld [vmem:[%s2960_s1 + $0x58] sm:$0xff]   ;;  %s1490_s17 = smul.u32 (%p2342_p9), 14, %s2319_s22 }
  0x48   : > { %1996 = vmatprep.subr.bf16.mxu1 %v2063_v2  ;;  %1744 = vmatprep.subr.bf16.mxu0 %v2063_v2  ;;  %v2068_v7 = vld [vmem:[%s2960_s1 + $0x20] sm:$0xff]   ;;  %v2070_v9 = vld [vmem:[%s2960_s1 + $0x18] sm:$0xff]   ;;  %v2071_v10 = vld [vmem:[%s2960_s1 + $0x50] sm:$0xff]   ;;  %s2888_s28 = scalar_lea.vmem [#allocation5], %s2014_s14 }
  0x49   : > { %v320_v11 = vld [vmem:[%s2401_s8 + $0x1c8] sm:$0xff]  ;;  %v327_v12 = vld [vmem:[%s2401_s8 + $0x200] sm:$0xff]  ;;  %v326_v23 = vld [vmem:[%s2401_s8 + $0x1f8] sm:$0xff]  ;;  %s1491_s25 = ssub.s32 (%p2342_p9), 25, %s1490_s17 }
  0x4a   : > { %v390_v13 = vpack.c.bf16 %v327_v12, %v320_v11  ;;  %v264_v14 = vld [vmem:[%s2401_s8 + $0x8] sm:$0xff]  ;;  %v271_v15 = vld [vmem:[%s2401_s8 + $0x40] sm:$0xff]  ;;  %v270_v26 = vld [vmem:[%s2401_s8 + $0x38] sm:$0xff]  ;;  %p1492_p6 = scmp.lt.s32.totalorder (%p2342_p9), %s1491_s25, 14 }
  0x4b   : > { %2004 = vmatpush3.bf16.msra.mxu1 %v2064_v3  ;;  %1745 = vmatpush3.bf16.msra.mxu0 %v2064_v3  ;;  %v2072_v16 = vld [vmem:[%s2960_s1 + $0x10] sm:$0xff]   ;;  %v362_v17 = vpack.c.bf16 %v271_v15, %v264_v14  ;;  %v2073_v18 = vld [vmem:[%s2960_s1 + $0x48] sm:$0xff]   ;;  %v2075_v20 = vld [vmem:[%s2960_s1 + $0x40] sm:$0xff]  }
  0x4c   : > { %1997 = vmatprep.subr.bf16.mxu1 %v2065_v4  ;;  %1746 = vmatprep.subr.bf16.mxu0 %v2065_v4  ;;  %v2074_v19 = vld [vmem:[%s2960_s1 + $0x8] sm:$0xff]   ;;  %v2076_v21 = vld [vmem:[%s2960_s1] sm:$0xff]   ;;  %v2077_v24 = vld [vmem:[%s2960_s1 + $0xf8] sm:$0xff]  }
  0x4d   : > { %895 = vmatprep.mubr.bf16.mxu1 %v390_v13  ;;  %863 = vmatprep.mubr.bf16.mxu0 %v362_v17  ;;  %v319_v22 = vld [vmem:[%s2401_s8 + $0x1c0] sm:$0xff]  ;;  %v2079_v27 = vld [vmem:[%s2960_s1 + $0x178] sm:$0xff]   ;;  %v285_v30 = vld [vmem:[%s2401_s8 + $0xb0] sm:$0xff] }
  0x4e   : > { %v263_v25 = vld [vmem:[%s2401_s8] sm:$0xff]  ;;  %v2078_v28 = vld [vmem:[%s2960_s1 + $0xb8] sm:$0xff]   ;;  %v389_v31 = vpack.c.bf16 %v326_v23, %v319_v22  ;;  %v341_v34 = vld [vmem:[%s2401_s8 + $0x270] sm:$0xff] }
  0x4f   : > { %2005 = vmatpush3.bf16.msra.mxu1 %v2066_v5  ;;  %1747 = vmatpush3.bf16.msra.mxu0 %v2066_v5  ;;  %v278_v29 = vld [vmem:[%s2401_s8 + $0x78] sm:$0xff]  ;;  %v361_v32 = vpack.c.bf16 %v270_v26, %v263_v25  ;;  %v2081_v36 = vld [vmem:[%s2960_s1 + $0xf0] sm:$0xff]   ;;  %v284_v42 = vld [vmem:[%s2401_s8 + $0xa8] sm:$0xff] }
  0x50   : > { %1998 = vmatprep.subr.bf16.mxu1 %v2067_v6  ;;  %1748 = vmatprep.subr.bf16.mxu0 %v2067_v6  ;;  %v334_v33 = vld [vmem:[%s2401_s8 + $0x238] sm:$0xff]  ;;  %v2083_v37 = vld [vmem:[%s2960_s1 + $0x170] sm:$0xff]   ;;  %v369_v40 = vpack.c.bf16 %v285_v30, %v278_v29  ;;  %v340_v46 = vld [vmem:[%s2401_s8 + $0x268] sm:$0xff] }
  0x51   : > { %v2080_v35 = vld [vmem:[%s2960_s1 + $0x138] sm:$0xff]   ;;  %v2082_v38 = vld [vmem:[%s2960_s1 + $0xb0] sm:$0xff]   ;;  %v397_v43 = vpack.c.bf16 %v341_v34, %v334_v33  ;;  %v2085_v44 = vld [vmem:[%s2960_s1 + $0xe8] sm:$0xff]  }
  0x52   : > { %v2084_v39 = vld [vmem:[%s2960_s1 + $0x130] sm:$0xff]   ;;  %v2087_v47 = vld [vmem:[%s2960_s1 + $0x168] sm:$0xff]   ;;  %v2089_v54 = vld [vmem:[%s2960_s1 + $0xe0] sm:$0xff]  }
  0x53   : > { %2006 = vmatpush3.bf16.msra.mxu1 %v2068_v7  ;;  %1749 = vmatpush3.bf16.msra.mxu0 %v2068_v7  ;;  %v277_v41 = vld [vmem:[%s2401_s8 + $0x70] sm:$0xff]  ;;  %v2086_v48 = vld [vmem:[%s2960_s1 + $0xa8] sm:$0xff]   ;;  %v299_v52 = vld [vmem:[%s2401_s8 + $0x120] sm:$0xff] }
  0x54   : > { %1999 = vmatprep.subr.bf16.mxu1 %v2069_v8  ;;  %1750 = vmatprep.subr.bf16.mxu0 %v2069_v8  ;;  %v333_v45 = vld [vmem:[%s2401_s8 + $0x230] sm:$0xff]  ;;  %v368_v49 = vpack.c.bf16 %v284_v42, %v277_v41  ;;  %v292_v51 = vld [vmem:[%s2401_s8 + $0xe8] sm:$0xff]  ;;  %v355_v60 = vld [vmem:[%s2401_s8 + $0x2e0] sm:$0xff] }
  0x55   : > { %v396_v50 = vpack.c.bf16 %v340_v46, %v333_v45  ;;  %v2088_v53 = vld [vmem:[%s2960_s1 + $0x128] sm:$0xff]   ;;  %v2091_v55 = vld [vmem:[%s2960_s1 + $0x160] sm:$0xff]   ;;  %v376_v59 = vpack.c.bf16 %v299_v52, %v292_v51  ;;  %v2093_v61 = vld [vmem:[%s2960_s1 + $0xd8] sm:$0xff]  }
  0x56   : > { %v348_v56 = vld [vmem:[%s2401_s8 + $0x2a8] sm:$0xff]  ;;  %v2090_v57 = vld [vmem:[%s2960_s1 + $0xa0] sm:$0xff]   ;;  %v298_v63 = vld [vmem:[%s2401_s8 + $0x118] sm:$0xff] }
  0x57   : > { %2007 = vmatpush3.bf16.msra.mxu1 %v2070_v9  ;;  %1751 = vmatpush3.bf16.msra.mxu0 %v2070_v9  ;;  %v2092_v58 = vld [vmem:[%s2960_s1 + $0x120] sm:$0xff]   ;;  %v404_v0 = vpack.c.bf16 %v355_v60, %v348_v56  ;;  %v354_v2 = vld [vmem:[%s2401_s8 + $0x2d8] sm:$0xff]  ;;  %v2097_v8 = vld [vmem:[%s2960_s1 + $0xd0] sm:$0xff]  }
  0x58   : > { %2000 = vmatprep.subr.bf16.mxu1 %v2071_v10  ;;  %1752 = vmatprep.subr.bf16.mxu0 %v2071_v10  ;;  %v291_v62 = vld [vmem:[%s2401_s8 + $0xe0] sm:$0xff]  ;;  %v2095_v3 = vld [vmem:[%s2960_s1 + $0x158] sm:$0xff]   ;;  %v313_v13 = vld [vmem:[%s2401_s8 + $0x190] sm:$0xff] }
  0x59   : > { %v347_v1 = vld [vmem:[%s2401_s8 + $0x2a0] sm:$0xff]  ;;  %v2094_v4 = vld [vmem:[%s2960_s1 + $0x98] sm:$0xff]   ;;  %v375_v5 = vpack.c.bf16 %v298_v63, %v291_v62  ;;  %v2101_v14 = vld [vmem:[%s2960_s1 + $0xc8] sm:$0xff]  }
  0x5a   : > { %v403_v6 = vpack.c.bf16 %v354_v2, %v347_v1  ;;  %v2096_v7 = vld [vmem:[%s2960_s1 + $0x118] sm:$0xff]   ;;  %v2099_v9 = vld [vmem:[%s2960_s1 + $0x150] sm:$0xff]   ;;  %v2105_v22 = vld [vmem:[%s2960_s1 + $0xc0] sm:$0xff]  }
  0x5b   : > { %2008 = vmatpush3.bf16.msra.mxu1 %v2072_v16  ;;  %1753 = vmatpush3.bf16.msra.mxu0 %v2072_v16  ;;  %v2098_v10 = vld [vmem:[%s2960_s1 + $0x90] sm:$0xff]   ;;  %v306_v12 = vld [vmem:[%s2401_s8 + $0x158] sm:$0xff]  ;;  %v312_v17 = vld [vmem:[%s2401_s8 + $0x188] sm:$0xff] }
  0x5c   : > { %2001 = vmatprep.subr.bf16.mxu1 %v2073_v18  ;;  %1754 = vmatprep.subr.bf16.mxu0 %v2073_v18  ;;  %v2100_v11 = vld [vmem:[%s2960_s1 + $0x110] sm:$0xff]   ;;  %v383_v15 = vpack.c.bf16 %v313_v13, %v306_v12  ;;  %v2103_v18 = vld [vmem:[%s2960_s1 + $0x148] sm:$0xff]   ;;  %v2107_v23 = vld [vmem:[%s2960_s1 + $0x140] sm:$0xff]  }
  0x5d   : > { %v305_v16 = vld [vmem:[%s2401_s8 + $0x150] sm:$0xff]  ;;  %v272_v30 = vld [vmem:[%s2401_s8 + $0x48] sm:$0xff]  ;;  %v267_v34 = vld [vmem:[%s2401_s8 + $0x20] sm:$0xff] }
  0x5e   : > { %v273_v25 = vld [vmem:[%s2401_s8 + $0x50] sm:$0xff]  ;;  %v279_v46 = vld [vmem:[%s2401_s8 + $0x80] sm:$0xff]  ;;  %v296_v52 = vld [vmem:[%s2401_s8 + $0x108] sm:$0xff] }
  0x5f   : > { %2009 = vmatpush3.bf16.msra.mxu1 %v2074_v19  ;;  %1755 = vmatpush3.bf16.msra.mxu0 %v2074_v19  ;;  %v2102_v19 = vld [vmem:[%s2960_s1 + $0x88] sm:$0xff]   ;;  %v2106_v26 = vld [vmem:[%s2960_s1 + $0x80] sm:$0xff]  }
  0x60   : > { %2002 = vmatprep.subr.bf16.mxu1 %v2075_v20  ;;  %1756 = vmatprep.subr.bf16.mxu0 %v2075_v20  ;;  %v382_v20 = vpack.c.bf16 %v312_v17, %v305_v16  ;;  %v265_v29 = vld [vmem:[%s2401_s8 + $0x10] sm:$0xff]  ;;  %v295_v60 = vld [vmem:[%s2401_s8 + $0x100] sm:$0xff]  ;;  %v308_v62 = vld [vmem:[%s2401_s8 + $0x168] sm:$0xff] }
  0x61   : > { %v289_v41 = vld [vmem:[%s2401_s8 + $0xd0] sm:$0xff]  ;;  %v315_v63 = vld [vmem:[%s2401_s8 + $0x1a0] sm:$0xff]  ;;  %v324_v12 = vld [vmem:[%s2401_s8 + $0x1e8] sm:$0xff] }
  0x62   : > { %v2109_v42 = vld [vmem:[%s2960_s1 + $0x180] sm:$0xff]  }
  0x63   : > { %2010 = vmatpush3.bf16.msra.mxu1 %v2076_v21  ;;  %1757 = vmatpush3.bf16.msra.mxu0 %v2076_v21  ;;  %v2104_v21 = vld [vmem:[%s2960_s1 + $0x108] sm:$0xff]   ;;  %v301_v51 = vld [vmem:[%s2401_s8 + $0x130] sm:$0xff]  ;;  %v331_v13 = vld [vmem:[%s2401_s8 + $0x220] sm:$0xff] }
  0x64   : > { %1800 = vmatprep.subr.bf16.mxu1 %v2077_v24  ;;  %1858 = vmatprep.subr.bf16.mxu0 %v2079_v27  ;;  %v266_v24 = vld [vmem:[%s2401_s8 + $0x18] sm:$0xff]  ;;  %v317_v1 = vld [vmem:[%s2401_s8 + $0x1b0] sm:$0xff]  ;;  %v394_v17 = vpack.c.bf16 %v331_v13, %v324_v12 }
  0x65   : > { %v364_v27 = vpack.c.bf16 %v273_v25, %v266_v24  ;;  %v338_v24 = vld [vmem:[%s2401_s8 + $0x258] sm:$0xff]  ;;  %v345_v25 = vld [vmem:[%s2401_s8 + $0x290] sm:$0xff] }
  0x66   : > { %896 = vmatmul.mubr.bf16.vlgmr.msra.gmra.mxu1 %v389_v31  ;;  %864 = vmatmul.mubr.bf16.vlgmr.msra.gmra.mxu0 %v361_v32  ;;  %v268_v31 = vld [vmem:[%s2401_s8 + $0x28] sm:$0xff]  ;;  %v275_v32 = vld [vmem:[%s2401_s8 + $0x60] sm:$0xff] }
  0x67   : > { %1801 = vmatpush3.bf16.msra.mxu1 %v2078_v28  ;;  %1859 = vmatpush3.bf16.msra.mxu0 %v2080_v35  ;;  %v2108_v28 = vld [vmem:[%s2960_s1 + $0x100] sm:$0xff]   ;;  %v366_v33 = vpack.c.bf16 %v275_v32, %v268_v31  ;;  %v274_v35 = vld [vmem:[%s2401_s8 + $0x58] sm:$0xff] }
  0x68   : > { %1802 = vmatprep.subr.bf16.mxu1 %v2081_v36  ;;  %1860 = vmatprep.subr.bf16.mxu0 %v2083_v37  ;;  %v280_v36 = vld [vmem:[%s2401_s8 + $0x88] sm:$0xff]  ;;  %v287_v37 = vld [vmem:[%s2401_s8 + $0xc0] sm:$0xff]  ;;  %v342_v31 = vld [vmem:[%s2401_s8 + $0x278] sm:$0xff] }
  0x69   : > { %871 = vmatprep.mubr.bf16.mxu0 %v369_v40  ;;  %903 = vmatprep.mubr.bf16.mxu1 %v397_v43  ;;  %v282_v40 = vld [vmem:[%s2401_s8 + $0x98] sm:$0xff]  ;;  %v371_v43 = vpack.c.bf16 %v287_v37, %v280_v36  ;;  %v337_v32 = vld [vmem:[%s2401_s8 + $0x250] sm:$0xff]  ;;  %v352_v36 = vld [vmem:[%s2401_s8 + $0x2c8] sm:$0xff] }
  0x6a   : > { %v373_v45 = vpack.c.bf16 %v289_v41, %v282_v40  ;;  %v359_v37 = vld [vmem:[%s2401_s8 + $0x300] sm:$0xff] }
  0x6b   : > { %1803 = vmatpush3.bf16.msra.mxu1 %v2082_v38  ;;  %1861 = vmatpush3.bf16.msra.mxu0 %v2084_v39  ;;  %v363_v38 = vpack.c.bf16 %v272_v30, %v265_v29  ;;  %v365_v39 = vpack.c.bf16 %v274_v35, %v267_v34  ;;  %v401_v29 = vpack.c.bf16 %v345_v25, %v338_v24  ;;  %v335_v30 = vld [vmem:[%s2401_s8 + $0x240] sm:$0xff]  ;;  %v350_v34 = vld [vmem:[%s2401_s8 + $0x2b8] sm:$0xff]  ;;  %v357_v35 = vld [vmem:[%s2401_s8 + $0x2f0] sm:$0xff] }
  0x6c   : > { %1804 = vmatprep.subr.bf16.mxu1 %v2085_v44  ;;  %1862 = vmatprep.subr.bf16.mxu0 %v2087_v47  ;;  %v2966_v44 = vmov 0.0   ;;  %v286_v47 = vld [vmem:[%s2401_s8 + $0xb8] sm:$0xff]  ;;  %v406_v40 = vpack.c.bf16 %v357_v35, %v350_v34  ;;  %v408_v41 = vpack.c.bf16 %v359_v37, %v352_v36 }
  0x6e   : > { %872 = vmatmul.mubr.bf16.gmra.mxu0 %v368_v49  ;;  %904 = vmatmul.mubr.bf16.gmra.mxu1 %v396_v50  ;;  %v288_v49 = vld [vmem:[%s2401_s8 + $0xc8] sm:$0xff]  ;;  %v294_v50 = vld [vmem:[%s2401_s8 + $0xf8] sm:$0xff] }
  0x6f   : > { %1805 = vmatpush3.bf16.msra.mxu1 %v2086_v48  ;;  %1863 = vmatpush3.bf16.msra.mxu0 %v2088_v53  ;;  %v281_v48 = vld [vmem:[%s2401_s8 + $0x90] sm:$0xff]  ;;  %v303_v53 = vld [vmem:[%s2401_s8 + $0x140] sm:$0xff]  ;;  %v378_v56 = vpack.c.bf16 %v301_v51, %v294_v50  ;;  %v276_v50 = vld [vmem:[%s2401_s8 + $0x68] sm:$0xff] }
  0x70   : > { %1806 = vmatprep.subr.bf16.mxu1 %v2089_v54  ;;  %1864 = vmatprep.subr.bf16.mxu0 %v2091_v55  ;;  %v370_v54 = vpack.c.bf16 %v286_v47, %v279_v46  ;;  %v372_v55 = vpack.c.bf16 %v288_v49, %v281_v48  ;;  %v358_v46 = vld [vmem:[%s2401_s8 + $0x2f8] sm:$0xff]  ;;  %v269_v49 = vld [vmem:[%s2401_s8 + $0x30] sm:$0xff] }
  0x71   : > { %879 = vmatprep.mubr.bf16.mxu0 %v376_v59  ;;  %911 = vmatprep.mubr.bf16.mxu1 %v404_v0  ;;  %v300_v59 = vld [vmem:[%s2401_s8 + $0x128] sm:$0xff]  ;;  %v310_v0 = vld [vmem:[%s2401_s8 + $0x178] sm:$0xff]  ;;  %v367_v51 = vpack.c.bf16 %v276_v50, %v269_v49 }
  0x73   : > { %1807 = vmatpush3.bf16.msra.mxu1 %v2090_v57  ;;  %1865 = vmatpush3.bf16.msra.mxu0 %v2092_v58  ;;  %v380_v57 = vpack.c.bf16 %v303_v53, %v296_v52  ;;  %v293_v58 = vld [vmem:[%s2401_s8 + $0xf0] sm:$0xff]  ;;  %v283_v52 = vld [vmem:[%s2401_s8 + $0xa0] sm:$0xff]  ;;  %v290_v53 = vld [vmem:[%s2401_s8 + $0xd8] sm:$0xff] }
  0x74   : > { %1808 = vmatprep.subr.bf16.mxu1 %v2093_v61  ;;  %1866 = vmatprep.subr.bf16.mxu0 %v2095_v3  ;;  %v302_v61 = vld [vmem:[%s2401_s8 + $0x138] sm:$0xff]  ;;  %v377_v2 = vpack.c.bf16 %v300_v59, %v293_v58  ;;  %v311_v58 = vld [vmem:[%s2401_s8 + $0x180] sm:$0xff] }
  0x75   : > { %v379_v3 = vpack.c.bf16 %v302_v61, %v295_v60  ;;  %v318_v59 = vld [vmem:[%s2401_s8 + $0x1b8] sm:$0xff]  ;;  %v325_v61 = vld [vmem:[%s2401_s8 + $0x1f0] sm:$0xff] }
  0x76   : > { %880 = vmatmul.mubr.bf16.gmra.mxu0 %v375_v5  ;;  %912 = vmatmul.mubr.bf16.gmra.mxu1 %v403_v6  ;;  %v387_v5 = vpack.c.bf16 %v317_v1, %v310_v0  ;;  %v307_v6 = vld [vmem:[%s2401_s8 + $0x160] sm:$0xff]  ;;  %v388_v60 = vpack.c.bf16 %v318_v59, %v311_v58  ;;  %v346_v1 = vld [vmem:[%s2401_s8 + $0x298] sm:$0xff] }
  0x77   : > { %1809 = vmatpush3.bf16.msra.mxu1 %v2094_v4  ;;  %1867 = vmatpush3.bf16.msra.mxu0 %v2096_v7  ;;  %v385_v4 = vpack.c.bf16 %v315_v63, %v308_v62  ;;  %v314_v7 = vld [vmem:[%s2401_s8 + $0x198] sm:$0xff]  ;;  %v332_v62 = vld [vmem:[%s2401_s8 + $0x228] sm:$0xff]  ;;  %v339_v0 = vld [vmem:[%s2401_s8 + $0x260] sm:$0xff] }
  0x78   : > { %1810 = vmatprep.subr.bf16.mxu1 %v2097_v8  ;;  %1868 = vmatprep.subr.bf16.mxu0 %v2099_v9  ;;  %v309_v8 = vld [vmem:[%s2401_s8 + $0x170] sm:$0xff]  ;;  %v316_v9 = vld [vmem:[%s2401_s8 + $0x1a8] sm:$0xff]  ;;  %v395_v63 = vpack.c.bf16 %v332_v62, %v325_v61 }
  0x79   : > { %887 = vmatprep.mubr.bf16.mxu0 %v383_v15  ;;  %952 = vmatprep.mubr.bf16.mxu1 %v364_v27  ;;  %v386_v15 = vpack.c.bf16 %v316_v9, %v309_v8 }
  0x7b   : > { %1811 = vmatpush3.bf16.msra.mxu1 %v2098_v10  ;;  %1869 = vmatpush3.bf16.msra.mxu0 %v2100_v11  ;;  %v322_v10 = vld [vmem:[%s2401_s8 + $0x1d8] sm:$0xff]  ;;  %v329_v11 = vld [vmem:[%s2401_s8 + $0x210] sm:$0xff] }
  0x7c   : > { %1812 = vmatprep.subr.bf16.mxu1 %v2101_v14  ;;  %1870 = vmatprep.subr.bf16.mxu0 %v2103_v18  ;;  %v384_v14 = vpack.c.bf16 %v314_v7, %v307_v6  ;;  %v392_v16 = vpack.c.bf16 %v329_v11, %v322_v10  ;;  %v321_v18 = vld [vmem:[%s2401_s8 + $0x1d0] sm:$0xff]  ;;  %v2110_v6 = vld [vmem:[%s2962_s3 + $0x8] sm:$0xff]  }
  0x7d   : > { %v2111_v7 = vld [vmem:[%s2962_s3] sm:$0xff]  }
  0x7e   : > { %888 = vmatmul.mubr.bf16.gmra.mxu0 %v382_v20  ;;  %v323_v20 = vld [vmem:[%s2401_s8 + $0x1e0] sm:$0xff] }
  0x7f   : > { %1813 = vmatpush3.bf16.msra.mxu1 %v2102_v19  ;;  %1871 = vmatpush3.bf16.msra.mxu0 %v2104_v21  ;;  %v328_v19 = vld [vmem:[%s2401_s8 + $0x208] sm:$0xff]  ;;  %v330_v21 = vld [vmem:[%s2401_s8 + $0x218] sm:$0xff] }
  0x80   : > { %1814 = vmatprep.subr.bf16.mxu1 %v2105_v22  ;;  %1872 = vmatprep.subr.bf16.mxu0 %v2107_v23  ;;  %v336_v22 = vld [vmem:[%s2401_s8 + $0x248] sm:$0xff]  ;;  %v343_v23 = vld [vmem:[%s2401_s8 + $0x280] sm:$0xff]  ;;  %v393_v27 = vpack.c.bf16 %v330_v21, %v323_v20 }
  0x81   : > { %1041 = vmatprep.mubr.bf16.mxu0 %v366_v33  ;;  %v344_v33 = vld [vmem:[%s2401_s8 + $0x288] sm:$0xff] }
  0x83   : > { %1815 = vmatpush3.bf16.msra.mxu1 %v2106_v26  ;;  %1873 = vmatpush3.bf16.msra.mxu0 %v2108_v28  ;;  %v391_v26 = vpack.c.bf16 %v328_v19, %v321_v18  ;;  %v399_v28 = vpack.c.bf16 %v343_v23, %v336_v22 }
  0x84   : > { %1933 = vmatprep.subr.bf16.mxu1 %v2966_v44  ;;  %1963 = vmatprep.subr.bf16.mxu0 %v2966_v44 }
  0x86   : > { %953 = vmatmul.mubr.bf16.vlgmr.msra.gmra.mxu1 %v363_v38  ;;  %1042 = vmatmul.mubr.bf16.vlgmr.msra.gmra.mxu0 %v365_v39  ;;  %v398_v38 = vpack.c.bf16 %v342_v31, %v335_v30  ;;  %v400_v39 = vpack.c.bf16 %v344_v33, %v337_v32 }
  0x87   : > { %1934 = vmatpush3.bf16.msra.mxu1 %v2109_v42  ;;  %960 = vmatprep.mubr.bf16.mxu1 %v371_v43  ;;  %v349_v42 = vld [vmem:[%s2401_s8 + $0x2b0] sm:$0xff]  ;;  %v356_v43 = vld [vmem:[%s2401_s8 + $0x2e8] sm:$0xff] }
  0x88   : > { %1049 = vmatprep.mubr.bf16.mxu0 %v373_v45  ;;  %v351_v45 = vld [vmem:[%s2401_s8 + $0x2c0] sm:$0xff]  ;;  %v405_v47 = vpack.c.bf16 %v356_v43, %v349_v42  ;;  %1964 = vmatpush3.bf16.msra.mxu0 %v2110_v6 }
  0x89   : > { %v407_v48 = vpack.c.bf16 %v358_v46, %v351_v45  ;;  %1965 = vmatprep.subr.bf16.mxu0 %v2966_v44 }
  0x8c   : > { %1966 = vmatpush3.bf16.msra.mxu0 %v2111_v7 }
  0x8e   : > { %961 = vmatmul.mubr.bf16.gmra.mxu1 %v370_v54  ;;  %1050 = vmatmul.mubr.bf16.gmra.mxu0 %v372_v55  ;;  %v374_v54 = vpack.c.bf16 %v290_v53, %v283_v52  ;;  %v297_v55 = vld [vmem:[%s2401_s8 + $0x110] sm:$0xff] }
  0x8f   : > { %968 = vmatprep.mubr.bf16.mxu1 %v378_v56  ;;  %1057 = vmatprep.mubr.bf16.mxu0 %v380_v57  ;;  %v304_v56 = vld [vmem:[%s2401_s8 + $0x148] sm:$0xff] }
  0x90   : > { %v381_v57 = vpack.c.bf16 %v304_v56, %v297_v55 }
  0x96   : > { %969 = vmatmul.mubr.bf16.gmra.mxu1 %v377_v2  ;;  %1058 = vmatmul.mubr.bf16.gmra.mxu0 %v379_v3  ;;  %v402_v2 = vpack.c.bf16 %v346_v1, %v339_v0  ;;  %v353_v3 = vld [vmem:[%s2401_s8 + $0x2d0] sm:$0xff] }
  0x97   : > { %976 = vmatprep.mubr.bf16.mxu1 %v385_v4  ;;  %1065 = vmatprep.mubr.bf16.mxu0 %v387_v5  ;;  %v360_v4 = vld [vmem:[%s2401_s8 + $0x308] sm:$0xff] }
  0x98   : > { %v409_v5 = vpack.c.bf16 %v360_v4, %v353_v3 }
  0x9e   : > { %977 = vmatmul.mubr.bf16.gmra.mxu1 %v384_v14  ;;  %1066 = vmatmul.mubr.bf16.gmra.mxu0 %v386_v15 }
  0x9f   : > { %984 = vmatprep.mubr.bf16.mxu1 %v392_v16  ;;  %1073 = vmatprep.mubr.bf16.mxu0 %v394_v17 }
  0xa6   : > { %985 = vmatmul.mubr.bf16.gmra.mxu1 %v391_v26  ;;  %1074 = vmatmul.mubr.bf16.gmra.mxu0 %v393_v27 }
  0xa7   : > { %992 = vmatprep.mubr.bf16.mxu1 %v399_v28  ;;  %1081 = vmatprep.mubr.bf16.mxu0 %v401_v29 }
  0xae   : > { %993 = vmatmul.mubr.bf16.gmra.mxu1 %v398_v38  ;;  %1082 = vmatmul.mubr.bf16.gmra.mxu0 %v400_v39 }
  0xaf   : > { %1000 = vmatprep.mubr.bf16.mxu1 %v406_v40  ;;  %1089 = vmatprep.mubr.bf16.mxu0 %v408_v41 }
  0xb6   : > { %1001 = vmatmul.mubr.bf16.gmra.mxu1 %v405_v47  ;;  %1090 = vmatmul.mubr.bf16.gmra.mxu0 %v407_v48 }
  0xb7   : > { %1935 = vmatprep.mubr.msk.bf16.mxu1 %vm2264_vm0, %v2966_v44  ;;  %1967 = vmatprep.mubr.msk.bf16.mxu0 %vm2264_vm0, %v2966_v44 }
  0xbe   : > { %1936 = vmatmul.mubr.msk.bf16.vlgmr.msra.gmra.mxu1 %vm809_vm1, %v367_v51 }
  0xbf   : > { %1939 = vmatprep.mubr.msk.bf16.mxu1 %vm2264_vm0, %v2966_v44 }
  0xc6   : > { %1940 = vmatmul.mubr.msk.bf16.gmra.mxu1 %vm809_vm1, %v374_v54 }
  0xc7   : > { %1943 = vmatprep.mubr.msk.bf16.mxu1 %vm2264_vm0, %v2966_v44 }
  0xce   : > { %1944 = vmatmul.mubr.msk.bf16.gmra.mxu1 %vm809_vm1, %v381_v57 }
  0xcf   : > { %1947 = vmatprep.mubr.msk.bf16.mxu1 %vm2264_vm0, %v2966_v44 }
  0xd6   : > { %1948 = vmatmul.mubr.msk.bf16.gmra.mxu1 %vm809_vm1, %v388_v60 }
  0xd7   : > { %1951 = vmatprep.mubr.msk.bf16.mxu1 %vm2264_vm0, %v2966_v44 }
  0xde   : > { %1952 = vmatmul.mubr.msk.bf16.gmra.mxu1 %vm809_vm1, %v395_v63 }
  0xdf   : > { %1955 = vmatprep.mubr.msk.bf16.mxu1 %vm2264_vm0, %v2966_v44 }
  0xe6   : > { %1956 = vmatmul.mubr.msk.bf16.gmra.mxu1 %vm809_vm1, %v402_v2 }
  0xe7   : > { %1959 = vmatprep.mubr.msk.bf16.mxu1 %vm2264_vm0, %v2966_v44 }
  0xee   : > { %1960 = vmatmul.mubr.msk.bf16.gmra.mxu1 %vm809_vm1, %v409_v5 }
 0x126   : > { %v1782_v8 = vpop.f32.mrf.mxu1  ;;  %v2684_v9 = vpop.f32.mrf.mxu0 }
 0x128   : > { %v1783_v10 = vpop.f32.mrf.mxu1  ;;  %v2686_v11 = vpop.f32.mrf.mxu0 }
 0x129   : > { %v2688_v12 = vadd.f32 %v1783_v10, %v1782_v8 }
 0x12a   : > { %v1785_v13 = vpop.f32.mrf.mxu1  ;;  %v2690_v14 = vpop.f32.mrf.mxu0 }
 0x12c   : > { %v1786_v15 = vpop.f32.mrf.mxu1  ;;  %v2692_v16 = vpop.f32.mrf.mxu0 }
 0x12d   : > { %v2694_v17 = vadd.f32 %v1786_v15, %v1785_v13  ;;  %v1763_v44 = vadd.f32 %v2692_v16, %v2690_v14 }
 0x12e   : > { %v2696_v18 = vpop.f32.mrf.mxu0  ;;  %v1788_v19 = vpop.f32.mrf.mxu1 }
 0x130   : > { %v2698_v20 = vpop.f32.mrf.mxu0  ;;  %v1789_v21 = vpop.f32.mrf.mxu1 }
 0x131   : > { %v2700_v22 = vadd.f32 %v1789_v21, %v1788_v19 }
 0x132   : > { %v2702_v23 = vpop.f32.mrf.mxu0  ;;  %v1791_v24 = vpop.f32.mrf.mxu1 }
 0x133   : > { %2971 = vst [vmem:[#allocation8_spill] sm:$0xff] %v2700_v22 }
 0x134   : > { %v2704_v25 = vpop.f32.mrf.mxu0  ;;  %v1792_v26 = vpop.f32.mrf.mxu1 }
 0x135   : > { %v2706_v27 = vadd.f32 %v1792_v26, %v1791_v24  ;;  %v1760_v24 = vadd.f32 %v2686_v11, %v2684_v9  ;;  %v1766_v11 = vadd.f32 %v2698_v20, %v2696_v18  ;;  %v1769_v16 = vadd.f32 %v2704_v25, %v2702_v23 }
 0x136   : > { %v2708_v28 = vpop.f32.mrf.mxu0  ;;  %v1794_v29 = vpop.f32.mrf.mxu1 }
 0x137   : > { %2972 = vst [vmem:[#allocation9_spill] sm:$0xff] %v2706_v27 }
 0x138   : > { %v2710_v30 = vpop.f32.mrf.mxu0  ;;  %v1795_v31 = vpop.f32.mrf.mxu1 }
 0x139   : > { %v2712_v32 = vadd.f32 %v1795_v31, %v1794_v29  ;;  %v2777_v31 = vld [vmem:[%s2961_s2] ss:$0 sm:$0xff] }
 0x13a   : > { %v2714_v33 = vpop.f32.mrf.mxu0  ;;  %v1797_v34 = vpop.f32.mrf.mxu1  ;;  %v874_v14 = vadd.f32 %v1766_v11, %v2777_v31 }
 0x13b   : > { %2973 = vst [vmem:[#allocation10_spill] sm:$0xff] %v2712_v32 }
 0x13c   : > { %v2716_v35 = vpop.f32.mrf.mxu0  ;;  %v1798_v36 = vpop.f32.mrf.mxu1 }
 0x13d   : > { %v2718_v37 = vadd.f32 %v1798_v36, %v1797_v34  ;;  %v866_v36 = vadd.f32 %v1760_v24, %v2777_v31 }
 0x13e   : > { %v2720_v38 = vpop.f32.mrf.mxu0 }
 0x13f   : > { %2974 = vst [vmem:[#allocation11_spill] sm:$0xff] %v2718_v37 }
 0x140   : > { %v2722_v39 = vpop.f32.mrf.mxu0 }
 0x142   : > { %v2724_v40 = vpop.f32.mrf.mxu0 }
 0x144   : > { %v2726_v41 = vpop.f32.mrf.mxu0 }
 0x146   : > { %v1816_v42 = vpop.f32.mrf.mxu1  ;;  %v1874_v43 = vpop.f32.mrf.mxu0 }
 0x148   : > { %v1817_v45 = vpop.f32.mrf.mxu1  ;;  %v1875_v46 = vpop.f32.mrf.mxu0 }
 0x149   : > { %v1818_v37 = vadd.f32 %v1817_v45, %v1816_v42 }
 0x14a   : > { %v1819_v47 = vpop.f32.mrf.mxu1  ;;  %v1877_v48 = vpop.f32.mrf.mxu0 }
 0x14b   : > { %v955_v22 = vadd.f32 %v1818_v37, %v866_v36 }
 0x14c   : > { %v1820_v49 = vpop.f32.mrf.mxu1  ;;  %v1878_v50 = vpop.f32.mrf.mxu0 }
 0x14d   : > { %v1879_v18 = vadd.f32 %v1878_v50, %v1877_v48 }
 0x14e   : > { %v1822_v51 = vpop.f32.mrf.mxu1  ;;  %v1880_v52 = vpop.f32.mrf.mxu0 }
 0x150   : > { %v1823_v53 = vpop.f32.mrf.mxu1  ;;  %v1881_v54 = vpop.f32.mrf.mxu0 }
 0x151   : > { %v1824_v20 = vadd.f32 %v1823_v53, %v1822_v51  ;;  %v1775_v51 = vadd.f32 %v2716_v35, %v2714_v33 }
 0x152   : > { %v1825_v55 = vpop.f32.mrf.mxu1  ;;  %v2728_v57 = vpop.f32.mrf.mxu0 }
 0x153   : > { %v963_v11 = vadd.f32 %v1824_v20, %v874_v14  ;;  %v885_v14 = vadd.f32 %v1775_v51, %v2777_v31 }
 0x154   : > { %v1826_v56 = vpop.f32.mrf.mxu1  ;;  %v1884_v60 = vpop.f32.mrf.mxu0 }
 0x155   : > { %v1885_v53 = vadd.f32 %v1884_v60, %v2728_v57 }
 0x156   : > { %v2730_v58 = vpop.f32.mrf.mxu1  ;;  %v2738_v63 = vpop.f32.mrf.mxu0 }
 0x158   : > { %v2732_v59 = vpop.f32.mrf.mxu1  ;;  %v2744_v2 = vpop.f32.mrf.mxu0 }
 0x159   : > { %v1888_v33 = vadd.f32 %v2744_v2, %v2738_v63 }
 0x15a   : > { %v2734_v61 = vpop.f32.mrf.mxu1  ;;  %v2750_v5 = vpop.f32.mrf.mxu0 }
 0x15c   : > { %v2736_v62 = vpop.f32.mrf.mxu1  ;;  %v2756_v8 = vpop.f32.mrf.mxu0 }
 0x15d   : > { %v1891_v2 = vadd.f32 %v2756_v8, %v2750_v5 }
 0x15e   : > { %v2740_v0 = vpop.f32.mrf.mxu1  ;;  %v2762_v15 = vpop.f32.mrf.mxu0 }
 0x160   : > { %v2742_v1 = vpop.f32.mrf.mxu1  ;;  %v2770_v26 = vpop.f32.mrf.mxu0 }
 0x162   : > { %v2746_v3 = vpop.f32.mrf.mxu1  ;;  %v2784_v32 = vpop.f32.mrf.mxu0 }
 0x164   : > { %v2748_v4 = vpop.f32.mrf.mxu1 }
 0x166   : > { %v2752_v6 = vpop.f32.mrf.mxu1 }
 0x168   : > { %v2754_v7 = vpop.f32.mrf.mxu1 }
 0x16a   : > { %v2758_v10 = vpop.f32.mrf.mxu1 }
 0x16c   : > { %v2760_v13 = vpop.f32.mrf.mxu1 }
 0x16e   : > { %v2764_v19 = vpop.f32.mrf.mxu1 }
 0x16f   : > { %2975 = vst [vmem:[#allocation12_spill] sm:$0xff] %v2764_v19  ;;  %v2793_v19 = vpop.f32.mrf.mxu0 }
 0x170   : > { %v2766_v21 = vpop.f32.mrf.mxu1 }
 0x171   : > { %2976 = vst [vmem:[#allocation13_spill] sm:$0xff] %v2766_v21  ;;  %v1876_v21 = vadd.f32 %v1875_v46, %v1874_v43  ;;  %v877_v46 = vadd.f32 %v1769_v16, %v2777_v31  ;;  %v1778_v16 = vadd.f32 %v2722_v39, %v2720_v38  ;;  %v1836_v38 = vadd.f32 %v2742_v1, %v2740_v0 }
 0x172   : > { %v2772_v29 = vpop.f32.mrf.mxu1  ;;  %v1839_v0 = vadd.f32 %v2748_v4, %v2746_v3 }
 0x173   : > { %2977 = vst [vmem:[#allocation14_spill] sm:$0xff] %v2772_v29  ;;  %v869_v29 = vadd.f32 %v1763_v44, %v2777_v31  ;;  %v1044_v44 = vadd.f32 %v1876_v21, %v955_v22  ;;  %v890_v20 = vadd.f32 %v1778_v16, %v2777_v31 }
 0x174   : > { %v2779_v34 = vpop.f32.mrf.mxu1 }
 0x175   : > { %2978 = vst [vmem:[#allocation15_spill] sm:$0xff] %v2779_v34  ;;  %v1821_v34 = vadd.f32 %v1820_v49, %v1819_v47  ;;  %v1772_v47 = vadd.f32 %v2710_v30, %v2708_v28  ;;  %v1882_v49 = vadd.f32 %v1881_v54, %v1880_v52  ;;  %v1830_v30 = vadd.f32 %v2732_v59, %v2730_v58 }
 0x176   : > { %v2786_v9 = vpop.f32.mrf.mxu1  ;;  %v1833_v58 = vadd.f32 %v2736_v62, %v2734_v61 }
 0x177   : > { %v958_v45 = vadd.f32 %v1821_v34, %v869_v29  ;;  %v882_v22 = vadd.f32 %v1772_v47, %v2777_v31 }
 0x178   : > { %v2790_v27 = vpop.f32.mrf.mxu1  ;;  %v974_v63 = vadd.f32 %v1833_v58, %v885_v14  ;;  %v2981_v58 = vld [vmem:[#allocation12_spill] sm:$0xff] }
 0x179   : > { %2979 = vst [vmem:[#allocation16_spill] sm:$0xff] %v2790_v27  ;;  %v2802_v27 = vpop.f32.mrf.mxu0  ;;  %v1047_v29 = vadd.f32 %v1879_v18, %v958_v45  ;;  %v971_v57 = vadd.f32 %v1830_v30, %v882_v22 }
 0x17a   : > { %v2795_v24 = vpop.f32.mrf.mxu1  ;;  %v1063_v5 = vadd.f32 %v1891_v2, %v974_v63  ;;  %v2984_v2 = vld [vmem:[#allocation14_spill] sm:$0xff] }
 0x17b   : > { %2980 = vst [vmem:[#allocation17_spill] sm:$0xff] %v2795_v24  ;;  %v1827_v24 = vadd.f32 %v1826_v56, %v1825_v55  ;;  %v2807_v23 = vpop.f32.mrf.mxu0  ;;  %v1052_v55 = vadd.f32 %v1882_v49, %v963_v11  ;;  %v979_v49 = vadd.f32 %v1836_v38, %v890_v20  ;;  %v2983_v20 = vld [vmem:[#allocation8_spill] sm:$0xff] }
 0x17c   : > { %v2800_v42 = vpop.f32.mrf.mxu1 }
 0x17d   : > { %v966_v28 = vadd.f32 %v1827_v24, %v877_v46  ;;  %v2815_v52 = vpop.f32.mrf.mxu0 }
 0x17e   : > { %v1132_v37 = vpop.f32.mrf.mxu1 }
 0x17f   : > { %v1133_v43 = vadd.f32 %v1132_v37, %v1044_v44  ;;  %v1902_v59 = vpop.f32.mrf.mxu0  ;;  %v1055_v24 = vadd.f32 %v1885_v53, %v966_v28  ;;  %v1781_v44 = vadd.f32 %v2726_v41, %v2724_v40  ;;  %v1060_v37 = vadd.f32 %v1888_v33, %v971_v57 }
 0x180   : > { %v1937_v36 = vpop.f32.mrf.mxu1  ;;  %v898_v28 = vadd.f32 %v2688_v12, %v2777_v31  ;;  %v901_v12 = vadd.f32 %v2694_v17, %v2777_v31  ;;  %v1903_v57 = vadd.f32 %v1902_v59, %v2815_v52 }
 0x181   : > { %v1641_v25 = vmul.f32 -1.442695, %v1133_v43  ;;  %v1904_v61 = vpop.f32.mrf.mxu0  ;;  %v1894_v36 = vadd.f32 %v2770_v26, %v2762_v15  ;;  %v893_v41 = vadd.f32 %v1781_v44, %v2777_v31  ;;  %v1842_v26 = vadd.f32 %v2754_v7, %v2752_v6 }
 0x182   : > { %v1135_v48 = vpop.f32.mrf.mxu1  ;;  %v1845_v6 = vadd.f32 %v2760_v13, %v2758_v10  ;;  %v906_v44 = vadd.f32 %v2983_v20, %v2777_v31 }
 0x183   : > { %2112 = vpow2.f32 %v1641_v25  ;;  %v1136_v50 = vadd.f32 %v1135_v48, %v1047_v29  ;;  %v1905_v1 = vpop.f32.mrf.mxu0  ;;  %v1068_v51 = vadd.f32 %v1894_v36, %v979_v49  ;;  %v982_v15 = vadd.f32 %v1839_v0, %v893_v41  ;;  %v2986_v41 = vld [vmem:[#allocation9_spill] sm:$0xff] }
 0x184   : > { %v1938_v21 = vpop.f32.mrf.mxu1  ;;  %v1906_v63 = vadd.f32 %v1905_v1, %v1904_v61  ;;  %v909_v0 = vadd.f32 %v2986_v41, %v2777_v31 }
 0x185   : > { %v1642_v54 = vmul.f32 -1.442695, %v1136_v50  ;;  %v1897_v50 = vadd.f32 %v2793_v19, %v2784_v32  ;;  %v1907_v53 = vpop.f32.mrf.mxu0  ;;  %v1900_v32 = vadd.f32 %v2807_v23, %v2802_v27  ;;  %v2982_v27 = vld [vmem:[#allocation13_spill] sm:$0xff] }
 0x186   : > { %v1140_v56 = vpop.f32.mrf.mxu1  ;;  %v1848_v23 = vadd.f32 %v2982_v27, %v2981_v58 }
 0x187   : > { %2114 = vpow2.f32 %v1642_v54  ;;  %v1141_v34 = vadd.f32 %v1140_v56, %v1052_v55  ;;  %v987_v55 = vadd.f32 %v1842_v26, %v898_v28  ;;  %v1908_v7 = vpop.f32.mrf.mxu0 }
 0x188   : > { %v1941_v35 = vpop.f32.mrf.mxu1 }
 0x189   : > { %v1643_v60 = vmul.f32 -1.442695, %v1141_v34  ;;  %v1071_v34 = vadd.f32 %v1897_v50, %v982_v15 }
 0x18a   : > { %v1143_v45 = vpop.f32.mrf.mxu1 }
 0x18b   : > { %2116 = vpow2.f32 %v1643_v60  ;;  %v1144_v18 = vadd.f32 %v1143_v45, %v1055_v24  ;;  %v990_v24 = vadd.f32 %v1845_v6, %v901_v12  ;;  %v1910_v45 = vpop.f32.mrf.mxu0  ;;  %v2991_v12 = vld [vmem:[#allocation11_spill] sm:$0xff] }
 0x18c   : > { %v1942_v39 = vpop.f32.mrf.mxu1 }
 0x18d   : > { %v1644_v62 = vmul.f32 -1.442695, %v1144_v18  ;;  %v1076_v18 = vadd.f32 %v1900_v32, %v987_v55  ;;  %v995_v39 = vadd.f32 %v1848_v23, %v906_v44 }
 0x18e   : > { %v1148_v43 = vpop.f32.mrf.mxu1 }
 0x18f   : > { %2118 = vpow2.f32 %v1644_v62  ;;  %v1149_v46 = vadd.f32 %v1148_v43, %v1060_v37  ;;  %v2985_v62 = vld [vmem:[#allocation15_spill] sm:$0xff]  ;;  %v1911_v43 = vpop.f32.mrf.mxu0  ;;  %v1084_v1 = vadd.f32 %v1906_v63, %v995_v39 }
 0x190   : > { %v2113_v47 = vpop.eup %2112  ;;  %v1945_v40 = vpop.f32.mrf.mxu1  ;;  %v1851_v37 = vadd.f32 %v2985_v62, %v2984_v2 }
 0x191   : > { %v1645_v11 = vmul.f32 -1.442695, %v1149_v46  ;;  %v1229_v8 = vadd.f32 1.0, %v2113_v47  ;;  %v1079_v47 = vadd.f32 %v1903_v57, %v990_v24 }
 0x192   : > { %v1151_v25 = vpop.f32.mrf.mxu1 }
 0x193   : > { %v1152_v29 = vadd.f32 %v1151_v25, %v1063_v5  ;;  %2120 = vpow2.f32 %v1645_v11 }
 0x194   : > { %v2115_v48 = vpop.eup %2114  ;;  %v1946_v22 = vpop.f32.mrf.mxu1  ;;  %2122 = vrcp.f32 %v1229_v8  ;;  %v1909_v8 = vadd.f32 %v1908_v7, %v1907_v53  ;;  %v1912_v53 = vadd.f32 %v1911_v43, %v1910_v45 }
 0x195   : > { %v1230_v21 = vadd.f32 1.0, %v2115_v48  ;;  %v1646_v3 = vmul.f32 -1.442695, %v1152_v29  ;;  %v998_v29 = vadd.f32 %v1851_v37, %v909_v0  ;;  %v2987_v48 = vld [vmem:[#allocation16_spill] sm:$0xff]  ;;  %v1913_v22 = vpop.f32.mrf.mxu0 }
 0x196   : > { %v1156_v4 = vpop.f32.mrf.mxu1  ;;  %v1854_v50 = vadd.f32 %v2987_v48, %v2786_v9 }
 0x197   : > { %2124 = vrcp.f32 %v1230_v21  ;;  %v1157_v30 = vadd.f32 %v1156_v4, %v1068_v51  ;;  %v1914_v6 = vpop.f32.mrf.mxu0 }
 0x198   : > { %v2117_v54 = vpop.eup %2116  ;;  %2126 = vpow2.f32 %v1646_v3  ;;  %v1949_v19 = vpop.f32.mrf.mxu1  ;;  %v2988_v3 = vld [vmem:[#allocation10_spill] sm:$0xff]  ;;  %v1915_v58 = vadd.f32 %v1914_v6, %v1913_v22 }
 0x199   : > { %v1647_v56 = vmul.f32 -1.442695, %v1157_v30  ;;  %v1231_v14 = vadd.f32 1.0, %v2117_v54  ;;  %v914_v4 = vadd.f32 %v2988_v3, %v2777_v31  ;;  %v2989_v54 = vmov 0.0   ;;  %v2990_v19 = vld [vmem:[#allocation17_spill] sm:$0xff] }
 0x19a   : > { %v1159_v16 = vpop.f32.mrf.mxu1  ;;  %v1857_v55 = vadd.f32 %v2800_v42, %v2990_v19 }
 0x19b   : > { %v1160_v33 = vadd.f32 %v1159_v16, %v1071_v34  ;;  %2128 = vpow2.f32 %v1647_v56  ;;  %v1003_v32 = vadd.f32 %v1854_v50, %v914_v4  ;;  %v1087_v56 = vadd.f32 %v1909_v8, %v998_v29  ;;  %v1655_v4 = vld [vmem:[%s2963_s4] ss:$0 sm:$0xff] }
 0x19c   : > { %v2119_v35 = vpop.eup %2118  ;;  %v1950_v60 = vpop.f32.mrf.mxu1  ;;  %2130 = vrcp.f32 %v1231_v14 }
 0x19d   : > { %v1232_v10 = vadd.f32 1.0, %v2119_v35  ;;  %v1648_v13 = vmul.f32 -1.442695, %v1160_v33  ;;  %v917_v33 = vadd.f32 %v2991_v12, %v2777_v31  ;;  %v1092_v45 = vadd.f32 %v1912_v53, %v1003_v32 }
 0x19e   : > { %v1164_v38 = vpop.f32.mrf.mxu1 }
 0x19f   : > { %2132 = vrcp.f32 %v1232_v10  ;;  %v1165_v17 = vadd.f32 %v1164_v38, %v1076_v18  ;;  %v1006_v60 = vadd.f32 %v1857_v55, %v917_v33 }
 0x1a0   : > { %2134 = vpow2.f32 %v1648_v13  ;;  %v1953_v52 = vpop.f32.mrf.mxu1  ;;  %v2121_v59 = vpop.eup %2120 }
 0x1a1   : > { %v1649_v46 = vmul.f32 -1.442695, %v1165_v17  ;;  %v1233_v49 = vadd.f32 1.0, %v2121_v59  ;;  %v2123_v40 = vpop.eup %2122  ;;  %v1095_v38 = vadd.f32 %v1915_v58, %v1006_v60 }
 0x1a2   : > { %v1167_v36 = vpop.f32.mrf.mxu1 }
 0x1a3   : > { %2136 = vpow2.f32 %v1649_v46  ;;  %v1168_v11 = vadd.f32 %v1167_v36, %v1079_v47 }
 0x1a4   : > { %v2125_v5 = vpop.eup %2124  ;;  %v1954_v61 = vpop.f32.mrf.mxu1  ;;  %2138 = vrcp.f32 %v1233_v49 }
 0x1a5   : > { %v2127_v25 = vpop.eup %2126  ;;  %v1650_v51 = vmul.f32 -1.442695, %v1168_v11  ;;  %v1271_v15 = vpack.c.bf16 %v2125_v5, %v2123_v40 }
 0x1a6   : > { %v1234_v26 = vadd.f32 1.0, %v2127_v25  ;;  %v1172_v21 = vpop.f32.mrf.mxu1 }
 0x1a7   : > { %2140 = vpow2.f32 %v1650_v51  ;;  %v1173_v28 = vadd.f32 %v1172_v21, %v1084_v1  ;;  %1968 = vmatmul.mubr.msk.bf16.vlgmr.msra.gmra.mxu0 %vm1301_vm2, %v1271_v15 }
 0x1a8   : > { %2142 = vrcp.f32 %v1234_v26  ;;  %v1957_v30 = vpop.f32.mrf.mxu1  ;;  %1971 = vmatprep.mubr.msk.bf16.mxu0 %vm2264_vm0, %v2989_v54  ;;  %v2129_v9 = vpop.eup %2128 }
 0x1a9   : > { %v1651_v7 = vmul.f32 -1.442695, %v1173_v28  ;;  %v1235_v34 = vadd.f32 1.0, %v2129_v9  ;;  %v2131_v16 = vpop.eup %2130 }
 0x1aa   : > { %v1175_v14 = vpop.f32.mrf.mxu1 }
 0x1ab   : > { %2144 = vpow2.f32 %v1651_v7  ;;  %v1176_v35 = vadd.f32 %v1175_v14, %v1087_v56 }
 0x1ac   : > { %v2133_v57 = vpop.eup %2132  ;;  %v1958_v27 = vpop.f32.mrf.mxu1  ;;  %2146 = vrcp.f32 %v1235_v34 }
 0x1ad   : > { %v2135_v23 = vpop.eup %2134  ;;  %v1652_v24 = vmul.f32 -1.442695, %v1176_v35  ;;  %v1272_v10 = vpack.c.bf16 %v2133_v57, %v2131_v16 }
 0x1ae   : > { %v1236_v42 = vadd.f32 1.0, %v2135_v23  ;;  %v1180_v13 = vpop.f32.mrf.mxu1 }
 0x1af   : > { %2148 = vpow2.f32 %v1652_v24  ;;  %v1181_v18 = vadd.f32 %v1180_v13, %v1092_v45  ;;  %1972 = vmatmul.mubr.msk.bf16.gmra.mxu0 %vm1301_vm2, %v1272_v10 }
 0x1b0   : > { %v2137_v20 = vpop.eup %2136  ;;  %2150 = vrcp.f32 %v1236_v42  ;;  %v1961_v31 = vpop.f32.mrf.mxu1  ;;  %1975 = vmatprep.mubr.msk.bf16.mxu0 %vm2264_vm0, %v2989_v54 }
 0x1b1   : > { %v1653_v44 = vmul.f32 -1.442695, %v1181_v18  ;;  %v1237_v17 = vadd.f32 1.0, %v2137_v20  ;;  %v2139_v63 = vpop.eup %2138 }
 0x1b2   : > { %v1183_v39 = vpop.f32.mrf.mxu1 }
 0x1b3   : > { %v1184_v52 = vadd.f32 %v1183_v39, %v1095_v38  ;;  %2152 = vpow2.f32 %v1653_v44 }
 0x1b4   : > { %v2141_v59 = vpop.eup %2140  ;;  %v1962_v2 = vpop.f32.mrf.mxu1  ;;  %2154 = vrcp.f32 %v1237_v17 }
 0x1b5   : > { %v2143_v62 = vpop.eup %2142  ;;  %v1238_v37 = vadd.f32 1.0, %v2141_v59  ;;  %v1654_v43 = vmul.f32 -1.442695, %v1184_v52 }
 0x1b6   : > { %v1273_v46 = vpack.c.bf16 %v2143_v62, %v2139_v63 }
 0x1b7   : > { %2156 = vrcp.f32 %v1238_v37 }
 0x1b8   : > { %v2145_v47 = vpop.eup %2144  ;;  %2158 = vpow2.f32 %v1654_v43  ;;  %1976 = vmatmul.mubr.msk.bf16.gmra.mxu0 %vm1301_vm2, %v1273_v46 }
 0x1b9   : > { %1979 = vmatprep.mubr.msk.bf16.mxu0 %vm2264_vm0, %v2989_v54  ;;  %v1239_v49 = vadd.f32 1.0, %v2145_v47  ;;  %v2147_v36 = vpop.eup %2146 }
 0x1bb   : > { %2160 = vrcp.f32 %v1239_v49 }
 0x1bc   : > { %v2149_v40 = vpop.eup %2148 }
 0x1bd   : > { %v2151_v41 = vpop.eup %2150  ;;  %v1240_v0 = vadd.f32 1.0, %v2149_v40 }
 0x1be   : > { %v1274_v11 = vpack.c.bf16 %v2151_v41, %v2147_v36 }
 0x1bf   : > { %2162 = vrcp.f32 %v1240_v0 }
 0x1c0   : > { %1980 = vmatmul.mubr.msk.bf16.gmra.mxu0 %vm1301_vm2, %v1274_v11  ;;  %v2153_v5 = vpop.eup %2152 }
 0x1c1   : > { %1983 = vmatprep.mubr.msk.bf16.mxu0 %vm2264_vm0, %v2989_v54  ;;  %v2155_v8 = vpop.eup %2154  ;;  %v1241_v61 = vadd.f32 1.0, %v2153_v5 }
 0x1c3   : > { %2164 = vrcp.f32 %v1241_v61 }
 0x1c4   : > { %v2157_v1 = vpop.eup %2156 }
 0x1c5   : > { %v2159_v25 = vpop.eup %2158  ;;  %v1275_v29 = vpack.c.bf16 %v2157_v1, %v2155_v8 }
 0x1c6   : > { %v1242_v48 = vadd.f32 1.0, %v2159_v25 }
 0x1c8   : > { %2166 = vrcp.f32 %v1242_v48  ;;  %1984 = vmatmul.mubr.msk.bf16.gmra.mxu0 %vm1301_vm2, %v1275_v29  ;;  %v2161_v50 = vpop.eup %2160 }
 0x1c9   : > { %1987 = vmatprep.mubr.msk.bf16.mxu0 %vm2264_vm0, %v2989_v54 }
 0x1cc   : > { %v2163_v22 = vpop.eup %2162 }
 0x1cd   : > { %v1276_v51 = vpack.c.bf16 %v2163_v22, %v2161_v50 }
 0x1d0   : > { %1988 = vmatmul.mubr.msk.bf16.gmra.mxu0 %vm1301_vm2, %v1276_v51  ;;  %v2165_v15 = vpop.eup %2164 }
 0x1d1   : > { %1991 = vmatprep.mubr.msk.bf16.mxu0 %vm2264_vm0, %v2989_v54 }
 0x1d5   : > { %v2167_v26 = vpop.eup %2166 }
 0x1d6   : > { %v1277_v21 = vpack.c.bf16 %v2167_v26, %v2165_v15 }
 0x1d8   : > { %1992 = vmatmul.mubr.msk.bf16.gmra.mxu0 %vm1301_vm2, %v1277_v21 }
 0x267   : > { %v1357_v3 = vpop.f32.mrf.mxu0 }
 0x268   : > { %v1358_v30 = vadd.f32 %v1655_v4, %v1357_v3 }
 0x269   : > { %v1969_v28 = vpop.f32.mrf.mxu0 }
 0x26b   : > { %v1360_v53 = vpop.f32.mrf.mxu0 }
 0x26c   : > { %v1361_v9 = vadd.f32 %v1655_v4, %v1360_v53 }
 0x26d   : > { %v1970_v32 = vpop.f32.mrf.mxu0 }
 0x26e   : > { %v1704_v19 = vpack.c.bf16 %v1361_v9, %v1358_v30 }
 0x26f   : > { %v1365_v55 = vpop.f32.mrf.mxu0 }
 0x270   : > { %1705 = vst [vmem:[%s2888_s28] sm:$0xff] %v1704_v19   ;;  %v1366_v7 = vadd.f32 %v1655_v4, %v1365_v55 }
 0x271   : > { %v1973_v54 = vpop.f32.mrf.mxu0 }
 0x273   : > { %v1368_v6 = vpop.f32.mrf.mxu0 }
 0x274   : > { %v1369_v56 = vadd.f32 %v1655_v4, %v1368_v6 }
 0x275   : > { %v1974_v34 = vpop.f32.mrf.mxu0 }
 0x276   : > { %v1709_v14 = vpack.c.bf16 %v1369_v56, %v1366_v7 }
 0x278   : > { %1736 = vst [vmem:[%s2888_s28 + $0x8] sm:$0xff] %v1709_v14   ;;  %v1373_v16 = vpop.f32.mrf.mxu0 }
 0x279   : > { %v1374_v35 = vadd.f32 %v1655_v4, %v1373_v16 }
 0x27a   : > { %v1977_v12 = vpop.f32.mrf.mxu0 }
 0x27c   : > { %v1376_v33 = vpop.f32.mrf.mxu0 }
 0x27d   : > { %v1377_v57 = vadd.f32 %v1655_v4, %v1376_v33 }
 0x27e   : > { %v1978_v58 = vpop.f32.mrf.mxu0 }
 0x27f   : > { %v1714_v27 = vpack.c.bf16 %v1377_v57, %v1374_v35 }
 0x280   : > { %v1381_v23 = vpop.f32.mrf.mxu0 }
 0x281   : > { %1737 = vst [vmem:[%s2888_s28 + $0x10] sm:$0xff] %v1714_v27   ;;  %v1382_v45 = vadd.f32 %v1655_v4, %v1381_v23 }
 0x282   : > { %v1981_v60 = vpop.f32.mrf.mxu0 }
 0x284   : > { %v1384_v24 = vpop.f32.mrf.mxu0 }
 0x285   : > { %v1385_v10 = vadd.f32 %v1655_v4, %v1384_v24 }
 0x286   : > { %v1982_v42 = vpop.f32.mrf.mxu0 }
 0x287   : > { %v1719_v13 = vpack.c.bf16 %v1385_v10, %v1382_v45 }
 0x288   : > { %v1389_v18 = vpop.f32.mrf.mxu0 }
 0x289   : > { %1738 = vst [vmem:[%s2888_s28 + $0x18] sm:$0xff] %v1719_v13   ;;  %v1390_v44 = vadd.f32 %v1655_v4, %v1389_v18 }
 0x28a   : > { %v1985_v20 = vpop.f32.mrf.mxu0 }
 0x28c   : > { %v1392_v31 = vpop.f32.mrf.mxu0 }
 0x28d   : > { %v1393_v38 = vadd.f32 %v1655_v4, %v1392_v31 }
 0x28e   : > { %v1986_v17 = vpop.f32.mrf.mxu0 }
 0x28f   : > { %v1724_v39 = vpack.c.bf16 %v1393_v38, %v1390_v44 }
 0x290   : > { %v1397_v63 = vpop.f32.mrf.mxu0 }
 0x291   : > { %1739 = vst [vmem:[%s2888_s28 + $0x20] sm:$0xff] %v1724_v39   ;;  %v1398_v2 = vadd.f32 %v1655_v4, %v1397_v63 }
 0x292   : > { %v1989_v52 = vpop.f32.mrf.mxu0 }
 0x294   : > { %v1400_v59 = vpop.f32.mrf.mxu0 }
 0x295   : > { %v1401_v62 = vadd.f32 %v1655_v4, %v1400_v59 }
 0x296   : > { %v1990_v37 = vpop.f32.mrf.mxu0 }
 0x297   : > { %v1729_v43 = vpack.c.bf16 %v1401_v62, %v1398_v2 }
 0x298   : > { %v1405_v46 = vpop.f32.mrf.mxu0 }
 0x299   : > { %1740 = vst [vmem:[%s2888_s28 + $0x28] sm:$0xff] %v1729_v43   ;;  %v1406_v36 = vadd.f32 %v1655_v4, %v1405_v46 }
 0x29a   : > { %v1993_v47 = vpop.f32.mrf.mxu0 }
 0x29c   : > { %v1408_v49 = vpop.f32.mrf.mxu0 }
 0x29d   : > { %v1409_v40 = vadd.f32 %v1655_v4, %v1408_v49  ;;  %1489 = sbr.rel (!%p2342_p9) target bundleno = 701 (0x2bd), region = 48 }
 0x29e   : > { %v1994_v41 = vpop.f32.mrf.mxu0 }
 0x29f   : > { %v1734_v0 = vpack.c.bf16 %v1409_v40, %v1406_v36 }
 0x2a1   : > { %1741 = vst [vmem:[%s2888_s28 + $0x30] sm:$0xff] %v1734_v0  }
 0x2a2   : > { %s3001_s25 = smov (!%p1492_p6, %s1491_s25), 14 }
 0x2a3   : > { %s2901_s6 = sshll.u32 %s3001_s25, 6 }
 0x2a4   : > { %s1496_s7 = ssub.s32 896, %s2901_s6 }
 0x2a5   : > { %1497 = vsyncadd %s1483_s16, %s1496_s7  ;;  %p1680_p10 = scmp.ne.s32.totalorder %s2901_s6, 0  ;;  %s1700_s29 = smul.u32 896, %s2319_s22 }
 0x2a6   : > { %s1502_s10 = sshll.u32 %s2888_s28, 4  ;;  %s2265_s9 = smov [#allocation5]   ;;  %s2914_s10 = int_to_ptr.vmem [resolvable:$true] %s1502_s10 }
 0x2a7   : > { %s2912_s23 = scalar_lea.hbm %s2964_s5, %s1700_s29  ;;  %s2194_s8 = scalar_lea.vmem %s2914_s10, %s2901_s6 }
 0x2a8   : > { %p2195_p9 = scmp.ne.s32.totalorder %s2914_s10, %s2194_s8  ;;  %s2198_s11 = sshll.u32 %s2265_s9, 4  ;;  %s2199_s11 = int_to_ptr.vmem [resolvable:$false] %s2198_s11 }
 0x2a9   : > { %s2200_s22 = scalar_lea.vmem %s2199_s11, 1792  ;;  %p2201_p7 = scmp.lt.s32.totalorder %s2914_s10, %s2199_s11 }
 0x2aa   : > { %p2196_p11 = pnand %p2195_p9, %p1680_p10  ;;  %p2202_p8 = scmp.lt.s32.totalorder %s2200_s22, %s2194_s8 }
 0x2ac   : > { %p2197_p13 = pneg %p2196_p11  ;;  %p2203_p12 = por %p2202_p8, %p2201_p7 }
 0x2ae   : > { %p2204_p0 = pnand %p2203_p12, %p2197_p13 }
 0x2b0   : > { %2207 = shalt.err (!%p2204_p0)
}
 0x2b1   : > { %s2208_s13 = scalar_lea.hbm %s2912_s23, %s2901_s6  ;;  %s2212_s17 = scalar_lea.hbm %s2964_s5, 1600 }
 0x2b2   : > { %p2209_p1 = scmp.ne.s32.totalorder %s2912_s23, %s2208_s13  ;;  %p2213_p4 = scmp.lt.s32.totalorder %s2912_s23, %s2964_s5 }
 0x2b3   : > { %p2214_p5 = scmp.lt.s32.totalorder %s2212_s17, %s2208_s13 }
 0x2b4   : > { %p2210_p3 = pnand %p2209_p1, %p1680_p10 }
 0x2b5   : > { %p2215_p6 = por %p2214_p5, %p2213_p4 }
 0x2b6   : > { %p2211_p2 = pneg %p2210_p3 }
 0x2b8   : > { %p2216_p9 = pnand %p2215_p6, %p2211_p2 }
 0x2ba   : > { %2219 = shalt.err (!%p2216_p9)
}
 0x2bb   : > { %s2266_s29 = smov 64   ;;  %s2267_s12 = smov 4  }
 0x2bc   : > { %1508 = dma.vmem_to_hbm [thread:$0]  (%p1680_p10), %s2914_s10, %s2901_s6, %s2912_s23, %s1483_s16, %s2266_s29, %s2266_s29, %s2267_s12  }
 0x2bd PF: > { %s1517_s15 = sand.u32 1, %s2246_s18   ;;  %p2992_p11 = scmp.ne.s32.totalorder %s2970_s30, 0 }
 0x2be   : > { %p2993_p13 = scmp.ge.s32.totalorder %s2258_s21, 2  ;;  %s1518_s8 = scalar_lea.sflag [#allocation4], %s1517_s15 }
 0x2c0   : > { %p2018_p7 = pnand %p2993_p13, %p2992_p11 }
 0x2c2   : > { %p2019_p8 = pneg %p2018_p7 }
 0x2c4   : > { %2241 = dma.done.wait (%p2019_p8), %s1518_s8, 896  }
 0x2c5   : > { %2243 = vsyncadd (%p2019_p8), %s1518_s8, 4294966400  ;;  %p18_p12 = scmp.ge.s32.totalorder %s2323_s24, 4   ;;  %s2994_s18 = smov %s2250_s19 }
 0x2c6   : > { %s2995_s19 = smov %s2254_s20  ;;  %s2996_s20 = smov %s2335_s27 }
 0x2c7   : > { %s2997_s21 = smov %s2323_s24  ;;  %20 = sbr.rel (!%p18_p12) target bundleno = 5 (0x5), region = 85 }
 0x2cc   :  { %1523 = vsyncpa [#allocation3], 1 }
 0x2cd   :  { %1525 = vsyncpa [#allocation3 + $0x1], 1 }
 0x2ce   :  { %1526 = vsyncpa [#allocation4], 1 }
 0x2cf   :  { %1528 = vsyncpa [#allocation4 + $0x1], 1 }

</bundles_post_ra>
